<compile_context>
chip_gen: v7x
topology: tpu7x:2x2x1
jax: 0.10.0
libtpu: 0.0.40
codegen_flags: <defaults>
</compile_context>

<pallas_src>
import functools
import math

import jax
import jax.numpy as jnp
from jax.experimental import pallas as pl
from jax.experimental.pallas import tpu as pltpu


# ---------------------------------------------------------------------------
# Pallas kernel: max-pool a slab of TB planes stored as (TB*h_in, w_in) rows.
# ---------------------------------------------------------------------------
def _maxpool_slab_kernel(sw_ref, x_ref, o_ref, *, k, s, rows_out, wv):
    # --- H axis: window offsets + stride folded into k sublane-strided reads.
    acc = x_ref[pl.ds(0, rows_out, stride=s), :]
    for kh in range(1, k):
        acc = jnp.maximum(acc, x_ref[pl.ds(kh, rows_out, stride=s), :])

    # --- W axis: sliding-window max (stride 1) via unit-stride lane slices.
    m = acc[:, 0:wv]
    for kw in range(1, k):
        m = jnp.maximum(m, acc[:, kw:kw + wv])

    # --- W stride subsample: exact 0/1 column-selection matmul on the MXU.
    y = jnp.dot(m, sw_ref[...], preferred_element_type=jnp.float32)
    o_ref[...] = y.astype(o_ref.dtype)


# ---------------------------------------------------------------------------
# Plane-batch (TB) choice: big blocks, modest VMEM, >= 2 grid steps if possible
# ---------------------------------------------------------------------------
def _choose_plane_batch(nc, h_in, h_out, w_in, itemsize,
                        block_budget_bytes=4 * 1024 * 1024):
    plane_bytes = max(1, h_in * w_in * itemsize)
    tb = max(1, block_budget_bytes // plane_bytes)
    if tb >= nc:
        return nc                                  # one full block (rows == full dim)
    # keep block row counts multiples of 8 (tiling constraint)
    g1 = 8 // math.gcd(h_in, 8)
    g2 = 8 // math.gcd(h_out, 8)
    mult = (g1 * g2) // math.gcd(g1, g2)
    tb = min(tb, -(-nc // 2))                      # leave >= 2 steps for megacore
    tb = max(mult, (tb // mult) * mult)
    if tb >= nc:
        return nc
    return tb


# ---------------------------------------------------------------------------
# Wrapper: F.max_pool2d(x, kernel_size, stride) for NCHW (padding=0, floor)
# ---------------------------------------------------------------------------
def _max_pool2d_nchw(x, kernel_size, stride):
    k = int(kernel_size)
    s = int(stride)
    n, c, h_in, w_in = x.shape
    # TODO(synk): only non-overlapping pooling (kernel_size == stride, stride | H)
    # is implemented in the Pallas kernel; general overlapping pooling needs a
    # different H-axis decomposition.
    assert k == s, "Pallas kernel implements kernel_size == stride only"
    assert h_in % s == 0, "Pallas kernel requires H divisible by stride"
    assert h_in >= k and w_in >= k

    h_out = (h_in - k) // s + 1          # == h_in // s here
    w_out = (w_in - k) // s + 1
    wv = w_in - k + 1
    nc = n * c

    # 0/1 selection matrix picking column ow*s out of the W sliding-window max.
    sw = (jnp.arange(wv, dtype=jnp.int32)[:, None]
          == (jnp.arange(w_out, dtype=jnp.int32) * s)[None, :]).astype(x.dtype)

    tb = _choose_plane_batch(nc, h_in, h_out, w_in, jnp.dtype(x.dtype).itemsize)
    rows_out = tb * h_out

    x_slab = x.reshape(nc * h_in, w_in)  # free view: NCHW rows are contiguous

    kernel = functools.partial(_maxpool_slab_kernel, k=k, s=s,
                               rows_out=rows_out, wv=wv)

    out = pl.pallas_call(
        kernel,
        out_shape=jax.ShapeDtypeStruct((nc * h_out, w_out), x.dtype),
        grid_spec=pltpu.PrefetchScalarGridSpec(
            num_scalar_prefetch=0,
            grid=(pl.cdiv(nc, tb),),
            in_specs=[
                pl.BlockSpec((wv, w_out), lambda i: (0, 0)),         # selection mat
                pl.BlockSpec((tb * h_in, w_in), lambda i: (i, 0)),   # TB planes
            ],
            out_specs=pl.BlockSpec((tb * h_out, w_out), lambda i: (i, 0)),
        ),
        compiler_params=pltpu.CompilerParams(
            dimension_semantics=("parallel",)),
    )(sw, x_slab)

    return out.reshape(n, c, h_out, w_out)


# ---------------------------------------------------------------------------
# Module equivalent
# ---------------------------------------------------------------------------
class MaxPool2dOctConv2dPallas:
    def __init__(self, channels, kernel_size, stride, alpha=0.5):
        assert 0 <= alpha <= 1, "Alpha must be in interval [0, 1]"
        self.ch_l = int(alpha * channels)
        self.ch_h = channels - self.ch_l
        self.kernel_size = kernel_size
        self.stride = stride

    def __call__(self, x):
        if self.ch_h == 0 or self.ch_l == 0:
            return _max_pool2d_nchw(x, self.kernel_size, self.stride)
        xh, xl = x
        yh = _max_pool2d_nchw(xh, self.kernel_size, self.stride)
        yl = _max_pool2d_nchw(xl, self.kernel_size, self.stride)
        return (yh, yl)


# ---------------------------------------------------------------------------
# Pure-JAX reference (matches F.max_pool2d: padding=0, floor mode)
# ---------------------------------------------------------------------------
def _ref_maxpool_nchw(x, k, s):
    return jax.lax.reduce_window(
        x, -jnp.inf, jax.lax.max,
        window_dimensions=(1, 1, k, k),
        window_strides=(1, 1, s, s),
        padding="VALID")


if __name__ == "__main__":
    key = jax.random.PRNGKey(0)
    k1, k2 = jax.random.split(key)

    channels = 4
    alpha = 0.5
    kernel_size = 2
    stride = 2
    batch = 2
    ch_l = int(alpha * channels)          # 2
    ch_h = channels - ch_l                # 2

    # Octave-conv convention: low-frequency branch at half spatial resolution.
    xh = jax.random.normal(k1, (batch, ch_h, 16, 16), dtype=jnp.float32)
    xl = jax.random.normal(k2, (batch, ch_l, 8, 8), dtype=jnp.float32)

    mod = MaxPool2dOctConv2dPallas(channels, kernel_size, stride, alpha=alpha)
    yh, yl = mod((xh, xl))
    yh = jax.block_until_ready(yh)
    yl = jax.block_until_ready(yl)

    assert yh.shape == (batch, ch_h, 8, 8), yh.shape
    assert yl.shape == (batch, ch_l, 4, 4), yl.shape

    ref_h = _ref_maxpool_nchw(xh, kernel_size, stride)
    ref_l = _ref_maxpool_nchw(xl, kernel_size, stride)
    assert jnp.allclose(yh, ref_h, atol=1e-6, rtol=1e-6)
    assert jnp.allclose(yl, ref_l, atol=1e-6, rtol=1e-6)

    # Also exercise the single-tensor path (alpha == 0 -> ch_l == 0).
    mod_single = MaxPool2dOctConv2dPallas(channels, kernel_size, stride, alpha=0.0)
    x_single = jax.random.normal(k1, (batch, channels, 16, 16), dtype=jnp.float32)
    y_single = jax.block_until_ready(mod_single(x_single))
    assert y_single.shape == (batch, channels, 8, 8), y_single.shape
    assert jnp.allclose(y_single, _ref_maxpool_nchw(x_single, kernel_size, stride),
                        atol=1e-6, rtol=1e-6)

    print("KERNEL_OK")
</pallas_src>

<mosaic_0001>
module attributes {stable_mosaic.version = 11 : i64} {
  func.func @_maxpool_slab_kernel(%arg0: i32, %arg1: memref<15x8xf32, #tpu.memory_space<vmem>>, %arg2: memref<64x16xf32, #tpu.memory_space<vmem>>, %arg3: memref<32x8xf32, #tpu.memory_space<vmem>>) attributes {dimension_semantics = [#tpu.dimension_semantics<parallel>], iteration_bounds = array<i64: 1>, scalar_prefetch = 0 : i64, scratch_operands = 0 : i64, tpu.core_type = #tpu.core_type<tc>, window_params = [{pipeline_mode = #tpu.pipeline_mode<synchronous>, transform_indices = @transform_0, window_bounds = array<i64: 15, 8>}, {transform_indices = @transform_1, window_bounds = array<i64: 64, 16>}, {transform_indices = @transform_2, window_bounds = array<i64: 32, 8>}]} {
    %c0 = arith.constant 0 : index
    %c0_0 = arith.constant 0 : index
    %0 = tpu.strided_load %arg2[%c0, %c0_0] {strides = array<i32: 2, 1>} : memref<64x16xf32, #tpu.memory_space<vmem>>, vector<32x16xf32>
    %c1 = arith.constant 1 : index
    %c0_1 = arith.constant 0 : index
    %1 = tpu.strided_load %arg2[%c1, %c0_1] {strides = array<i32: 2, 1>} : memref<64x16xf32, #tpu.memory_space<vmem>>, vector<32x16xf32>
    %2 = arith.maximumf %0, %1 : vector<32x16xf32>
    %3 = vector.extract_strided_slice %2 {offsets = [0, 0], sizes = [32, 15], strides = [1, 1]} : vector<32x16xf32> to vector<32x15xf32>
    %4 = vector.extract_strided_slice %2 {offsets = [0, 1], sizes = [32, 15], strides = [1, 1]} : vector<32x16xf32> to vector<32x15xf32>
    %5 = arith.maximumf %3, %4 : vector<32x15xf32>
    %c0_2 = arith.constant 0 : index
    %c0_3 = arith.constant 0 : index
    %6 = vector.load %arg1[%c0_2, %c0_3] : memref<15x8xf32, #tpu.memory_space<vmem>>, vector<15x8xf32>
    %cst = arith.constant dense<0.000000e+00> : vector<32x8xf32>
    %7 = tpu.matmul %5, %6, %cst {dimension_numbers = #tpu.dot_dimension_numbers<[1], [0], [0], [1], [0, 0, 1, 1], [], []>} : vector<32x15xf32>, vector<15x8xf32>, vector<32x8xf32> -> vector<32x8xf32>
    %c0_4 = arith.constant 0 : index
    %c0_5 = arith.constant 0 : index
    %8 = vector.load %arg3[%c0_4, %c0_5] : memref<32x8xf32, #tpu.memory_space<vmem>>, vector<32x8xf32>
    tpu.vector_store %arg3[%c0_4, %c0_5], %7 {strides = array<i32>} : memref<32x8xf32, #tpu.memory_space<vmem>>, vector<32x8xf32>,
    return
  }
  func.func @transform_0(%arg0: i32) -> (i32, i32) {
    %c0_i32 = arith.constant 0 : i32
    %c0_i32_0 = arith.constant 0 : i32
    %c0_i32_1 = arith.constant 0 : i32
    return %c0_i32, %c0_i32_0 : i32, i32
  }
  func.func @transform_1(%arg0: i32) -> (i32, i32) {
    %c0_i32 = arith.constant 0 : i32
    %c0_i32_0 = arith.constant 0 : i32
    return %arg0, %c0_i32 : i32, i32
  }
  func.func @transform_2(%arg0: i32) -> (i32, i32) {
    %c0_i32 = arith.constant 0 : i32
    %c0_i32_0 = arith.constant 0 : i32
    return %arg0, %c0_i32 : i32, i32
  }
}

</mosaic_0001>

<bundles_post_ra>
// kernel: tpu_custom_call.1
= control target key start
LH: loop header
LB: loop body
LE: loop exit
PB: predicated region body
PF: predicated region fallthrough
CT: control target
= control target key end

     0   :  { %vm65_vm0 = vcmask 1046528   ;;  %s201_s27 = smov 127   ;;  %vm202_vm1 = vmmov 1   ;;  %vm52_vm3 = vcmask 121856   ;;  %vm154_vm4 = vcmask 64512   ;;  %s261_s1 = inlined_call_operand.vmem [shape: f32[64,16], index: 1, kind: input, shape index: {}]   ;;  %s262_s0 = inlined_call_operand.vmem [shape: f32[15,8], index: 0, kind: input, shape index: {}]   ;;  %s263_s2 = inlined_call_operand.vmem [shape: f32[32,8], index: 2, kind: output, shape index: {}]  }
   0x1   :  { %v11_v0 = vld [vmem:[%s261_s1] ss:$2 sm:$0xff]  ;;  %v166_v1 = vld [vmem:[%s261_s1 + $0x1] ss:$2 sm:$0xff]  ;;  %v163_v2 = vld [vmem:[%s261_s1 + $0x10] ss:$2 sm:$0xff] }
   0x2   :  { %v26_v3 = vmax.f32 %v11_v0, %v166_v1  ;;  %v167_v4 = vld [vmem:[%s261_s1 + $0x11] ss:$2 sm:$0xff]  ;;  %v164_v5 = vld [vmem:[%s261_s1 + $0x20] ss:$2 sm:$0xff]  ;;  %v168_v6 = vld [vmem:[%s261_s1 + $0x21] ss:$2 sm:$0xff] }
   0x3   :  { %v27_v7 = vmax.f32 %v163_v2, %v167_v4  ;;  %v165_v8 = vld [vmem:[%s261_s1 + $0x30] ss:$2 sm:$0xff]  ;;  %v169_v9 = vld [vmem:[%s261_s1 + $0x31] ss:$2 sm:$0xff]  ;;  %v50_v10 = vld [vmem:[%s262_s0] sm:$0xff]  ;;  %v28_v11 = vmax.f32 %v164_v5, %v168_v6 }
   0x4   :  { %34 = vrot.lane.b32.xlu0 %v26_v3, %s201_s27  ;;  %v51_v12 = vld [vmem:[%s262_s0 + $0x8] sm:$0x7f]  ;;  %vm192_vm2 = vmpackc.low %vm65_vm0, %vm202_vm1  ;;  %v29_v13 = vmax.f32 %v165_v8, %v169_v9 }
   0x5   :  { %36 = vrot.lane.b32.xlu1 %v27_v7, %s201_s27  ;;  %v191_v14 = vpack.c.bf16 %v51_v12, %v50_v10 }
   0x7   :  { %193 = vmatprep.subr.msk.bf16.mxu0 %vm192_vm2, %v191_v14  ;;  %197 = vmatprep.subr.msk.bf16.mxu1 %vm192_vm2, %v191_v14 }
   0x8   :  { %38 = vrot.lane.b32.xlu0 %v28_v11, %s201_s27  ;;  %196 = vmatpush3.bf16.msk.msra.mxu0 %vm192_vm2, %v191_v14 }
   0x9   :  { %40 = vrot.lane.b32.xlu1 %v29_v13, %s201_s27  ;;  %198 = vmatpush3.bf16.msk.msra.mxu1 %vm192_vm2, %v191_v14 }
  0x76   :  { %v35_v15 = vpop.permute.xlu0 %34 }
  0x77   :  { %v46_v16 = vmax.f32 %v26_v3, %v35_v15  ;;  %v37_v17 = vpop.permute.xlu1 %36 }
  0x78   :  { %v47_v18 = vmax.f32 %v27_v7, %v37_v17 }
  0x79   :  { %185 = vmatprep.mubr.msk.f32.mxu0 %vm52_vm3, %v46_v16 }
  0x7a   :  { %v39_v19 = vpop.permute.xlu0 %38  ;;  %186 = vmatmul.mubr.msk.f32.vlgmr.msra.gmra.mrb[0].mxu0 %vm52_vm3, %v47_v18 }
  0x7b   :  { %v48_v20 = vmax.f32 %v28_v11, %v39_v19  ;;  %v41_v21 = vpop.permute.xlu1 %40 }
  0x7c   :  { %v49_v22 = vmax.f32 %v29_v13, %v41_v21 }
  0x7d   :  { %188 = vmatprep.mubr.msk.f32.mxu1 %vm52_vm3, %v48_v20 }
  0x7e   :  { %189 = vmatmul.mubr.msk.f32.vlgmr.msra.gmra.mrb[0].mxu1 %vm52_vm3, %v49_v22 }
 0x14d   :  { %v187_v23 = vpop.f32.mrb[0].mxu0 }
 0x14e   :  { %156 = vst.msk [vmem:[%s263_s2 + $0x8] sm:$0xff] %vm154_vm4, %v187_v23  ;;  %v135_v24 = vpop.f32.mrb[1].mxu0 }
 0x14f   :  { %155 = vst.msk [vmem:[%s263_s2] sm:$0xff] %vm154_vm4, %v135_v24 }
 0x151   :  { %v190_v25 = vpop.f32.mrb[0].mxu1 }
 0x152   :  { %158 = vst.msk [vmem:[%s263_s2 + $0x18] sm:$0xff] %vm154_vm4, %v190_v25  ;;  %v145_v26 = vpop.f32.mrb[1].mxu1 }
 0x153   :  { %157 = vst.msk [vmem:[%s263_s2 + $0x10] sm:$0xff] %vm154_vm4, %v145_v26 }

</bundles_post_ra>
